<compile_context>
chip_gen: v6e
topology: v6e:2x2x1
jax: 0.10.0
libtpu: 0.0.40
codegen_flags: <defaults>
</compile_context>

<pallas_src>
import functools

import jax
import jax.numpy as jnp
from jax.experimental import pallas as pl
from jax.experimental.pallas import tpu as pltpu

HIDDEN = 128        # hidden width of the common layer (matches nn.Linear(state_size, 128))
HEAD_W = 128        # lane-dense padded width of the fused actor+critic head (A + 1 <= 128)


def actor_critic_kernel(state_ref, w1_ref, b1_ref, wh_ref, bh_ref, out_ref, *, num_actions):
    # common: x = relu(state @ W1 + b1)            [TB, H]
    x = jnp.dot(state_ref[...], w1_ref[...], preferred_element_type=jnp.float32)
    x = jnp.maximum(x + b1_ref[...], 0.0)

    # fused head: y = x @ [Wa | Wc | 0] + [ba | bc | 0]   [TB, 128]
    #   lanes 0..A-1 -> actor logits, lane A -> critic value, lanes > A -> 0
    y = jnp.dot(x, wh_ref[...], preferred_element_type=jnp.float32) + bh_ref[...]

    lane = jax.lax.broadcasted_iota(jnp.int32, y.shape, 1)
    neg_big = jnp.float32(-1e30)
    logits = jnp.where(lane < num_actions, y, neg_big)

    # max-stabilized softmax over the real action lanes (padded lanes contribute exp(...)≈0)
    m = jnp.max(logits, axis=-1, keepdims=True)
    e = jnp.exp(logits - m)
    denom = jnp.sum(e, axis=-1, keepdims=True)
    probs = e / denom  # exact division for strict parity with torch.nn.Softmax

    # lane-dense output slab: probs in lanes 0..A-1, raw critic value in lane A, zeros after.
    out_ref[...] = jnp.where(lane == num_actions, y, probs).astype(out_ref.dtype)


def actor_critic_forward(state, w1, b1, wa, ba, wc, bc, *, block_b=1024):
    B, S = state.shape
    H = w1.shape[1]
    A = wa.shape[1]
    assert H == HIDDEN and A + 1 <= HEAD_W

    # Fuse + lane-pad the two heads into one [H, 128] weight and one [1, 128] bias.
    w_head = jnp.zeros((H, HEAD_W), jnp.float32)
    w_head = w_head.at[:, :A].set(wa).at[:, A:A + 1].set(wc)
    b_head = jnp.zeros((1, HEAD_W), jnp.float32)
    b_head = b_head.at[:, :A].set(ba).at[:, A:A + 1].set(bc)

    # Batch tiling: sublane-align, then make the padded batch a multiple of the tile.
    b_pad = max(8, pl.cdiv(B, 8) * 8)
    tb = min(block_b, b_pad)
    b_pad = pl.cdiv(b_pad, tb) * tb
    if b_pad != B:
        state = jnp.pad(state, ((0, b_pad - B), (0, 0)))

    grid = (b_pad // tb,)

    out = pl.pallas_call(
        functools.partial(actor_critic_kernel, num_actions=A),
        out_shape=jax.ShapeDtypeStruct((b_pad, HEAD_W), jnp.float32),
        grid=grid,
        in_specs=[
            pl.BlockSpec((tb, S), lambda i: (i, 0)),        # state: blocked over batch
            pl.BlockSpec((S, H), lambda i: (0, 0)),         # W_common: VMEM-resident
            pl.BlockSpec((1, H), lambda i: (0, 0)),         # b_common
            pl.BlockSpec((H, HEAD_W), lambda i: (0, 0)),    # fused head weight
            pl.BlockSpec((1, HEAD_W), lambda i: (0, 0)),    # fused head bias
        ],
        out_specs=pl.BlockSpec((tb, HEAD_W), lambda i: (i, 0)),
        compiler_params=pltpu.CompilerParams(
            dimension_semantics=("parallel",),              # shard batch tiles across v7x TCs
        ),
    )(state, w1, b1, w_head, b_head)

    action_probs = out[:B, :A]
    state_values = out[:B, A:A + 1]
    return action_probs, state_values


def init_params(key, state_size, action_size, hidden=HIDDEN):
    # Deterministic init mimicking nn.Linear default: U(-1/sqrt(fan_in), 1/sqrt(fan_in)).
    ks = jax.random.split(key, 6)

    def lin(kw, kb, fan_in, fan_out):
        bound = 1.0 / jnp.sqrt(fan_in)
        w = jax.random.uniform(kw, (fan_in, fan_out), jnp.float32, -bound, bound)
        b = jax.random.uniform(kb, (1, fan_out), jnp.float32, -bound, bound)
        return w, b

    w1, b1 = lin(ks[0], ks[1], state_size, hidden)
    wa, ba = lin(ks[2], ks[3], hidden, action_size)
    wc, bc = lin(ks[4], ks[5], hidden, 1)
    return w1, b1, wa, ba, wc, bc


if __name__ == "__main__":
    key = jax.random.PRNGKey(0)
    k_state, k_params = jax.random.split(key)

    batch = 2
    state_size = 16
    action_size = 4

    state = jax.random.normal(k_state, (batch, state_size), dtype=jnp.float32)
    params = init_params(k_params, state_size, action_size)

    action_probs, state_values = actor_critic_forward(state, *params)
    jax.block_until_ready((action_probs, state_values))

    # reference check in plain JAX
    w1, b1, wa, ba, wc, bc = params
    x = jnp.maximum(state @ w1 + b1, 0.0)
    ref_probs = jax.nn.softmax(x @ wa + ba, axis=-1)
    ref_vals = x @ wc + bc

    assert action_probs.shape == (batch, action_size)
    assert state_values.shape == (batch, 1)
    assert jnp.allclose(action_probs, ref_probs, atol=1e-5)
    assert jnp.allclose(state_values, ref_vals, atol=1e-5)
    assert jnp.allclose(jnp.sum(action_probs, axis=-1), 1.0, atol=1e-5)

    print("KERNEL_OK")
</pallas_src>

<mosaic_0001>
module attributes {stable_mosaic.version = 11 : i64} {
  func.func @actor_critic_kernel(%arg0: i32, %arg1: memref<8x16xf32, #tpu.memory_space<vmem>>, %arg2: memref<16x128xf32, #tpu.memory_space<vmem>>, %arg3: memref<1x128xf32, #tpu.memory_space<vmem>>, %arg4: memref<128x128xf32, #tpu.memory_space<vmem>>, %arg5: memref<1x128xf32, #tpu.memory_space<vmem>>, %arg6: memref<8x128xf32, #tpu.memory_space<vmem>>) attributes {dimension_semantics = [#tpu.dimension_semantics<parallel>], iteration_bounds = array<i64: 1>, scalar_prefetch = 0 : i64, scratch_operands = 0 : i64, tpu.core_type = #tpu.core_type<tc>, window_params = [{transform_indices = @transform_0, window_bounds = array<i64: 8, 16>}, {pipeline_mode = #tpu.pipeline_mode<synchronous>, transform_indices = @transform_1, window_bounds = array<i64: 16, 128>}, {pipeline_mode = #tpu.pipeline_mode<synchronous>, transform_indices = @transform_2, window_bounds = array<i64: 1, 128>}, {pipeline_mode = #tpu.pipeline_mode<synchronous>, transform_indices = @transform_3, window_bounds = array<i64: 128, 128>}, {pipeline_mode = #tpu.pipeline_mode<synchronous>, transform_indices = @transform_4, window_bounds = array<i64: 1, 128>}, {transform_indices = @transform_5, window_bounds = array<i64: 8, 128>}]} {
    %c0 = arith.constant 0 : index
    %c0_0 = arith.constant 0 : index
    %0 = vector.load %arg1[%c0, %c0_0] : memref<8x16xf32, #tpu.memory_space<vmem>>, vector<8x16xf32>
    %c0_1 = arith.constant 0 : index
    %c0_2 = arith.constant 0 : index
    %1 = vector.load %arg2[%c0_1, %c0_2] : memref<16x128xf32, #tpu.memory_space<vmem>>, vector<16x128xf32>
    %cst = arith.constant dense<0.000000e+00> : vector<8x128xf32>
    %2 = tpu.matmul %0, %1, %cst {dimension_numbers = #tpu.dot_dimension_numbers<[1], [0], [0], [1], [0, 0, 1, 1], [], []>} : vector<8x16xf32>, vector<16x128xf32>, vector<8x128xf32> -> vector<8x128xf32>
    %c0_3 = arith.constant 0 : index
    %c0_4 = arith.constant 0 : index
    %3 = vector.load %arg3[%c0_3, %c0_4] : memref<1x128xf32, #tpu.memory_space<vmem>>, vector<1x128xf32>
    %4 = vector.broadcast %3 : vector<1x128xf32> to vector<8x128xf32>
    %5 = arith.addf %2, %4 : vector<8x128xf32>
    %cst_5 = arith.constant 0.000000e+00 : f32
    %6 = vector.broadcast %cst_5 : f32 to vector<8x128xf32>
    %7 = arith.maximumf %5, %6 : vector<8x128xf32>
    %c0_6 = arith.constant 0 : index
    %c0_7 = arith.constant 0 : index
    %8 = vector.load %arg4[%c0_6, %c0_7] : memref<128x128xf32, #tpu.memory_space<vmem>>, vector<128x128xf32>
    %cst_8 = arith.constant dense<0.000000e+00> : vector<8x128xf32>
    %9 = tpu.matmul %7, %8, %cst_8 {dimension_numbers = #tpu.dot_dimension_numbers<[1], [0], [0], [1], [0, 0, 1, 1], [], []>} : vector<8x128xf32>, vector<128x128xf32>, vector<8x128xf32> -> vector<8x128xf32>
    %c0_9 = arith.constant 0 : index
    %c0_10 = arith.constant 0 : index
    %10 = vector.load %arg5[%c0_9, %c0_10] : memref<1x128xf32, #tpu.memory_space<vmem>>, vector<1x128xf32>
    %11 = vector.broadcast %10 : vector<1x128xf32> to vector<8x128xf32>
    %12 = arith.addf %9, %11 : vector<8x128xf32>
    %13 = tpu.iota {dimensions = array<i32: 1>} : vector<8x128xi32>
    %c4_i32 = arith.constant 4 : i32
    %14 = vector.broadcast %c4_i32 : i32 to vector<8x128xi32>
    %15 = arith.cmpi slt, %13, %14 : vector<8x128xi32>
    %cst_11 = arith.constant -1.000000e+30 : f32
    %16 = vector.broadcast %cst_11 : f32 to vector<8x128xf32>
    %17 = arith.select %15, %12, %16 : vector<8x128xi1>, vector<8x128xf32>
    %cst_12 = arith.constant dense<0xFF800000> : vector<8xf32>
    %18 = vector.multi_reduction <maximumf>, %17, %cst_12 [1] : vector<8x128xf32> to vector<8xf32>
    %19 = vector.shape_cast %18 : vector<8xf32> to vector<8x1xf32>
    %20 = vector.broadcast %19 : vector<8x1xf32> to vector<8x128xf32>
    %21 = arith.subf %17, %20 : vector<8x128xf32>
    %22 = math.exp %21 : vector<8x128xf32>
    %cst_13 = arith.constant dense<0.000000e+00> : vector<8xf32>
    %23 = vector.multi_reduction <add>, %22, %cst_13 [1] : vector<8x128xf32> to vector<8xf32>
    %24 = vector.shape_cast %23 : vector<8xf32> to vector<8x1xf32>
    %25 = vector.broadcast %24 : vector<8x1xf32> to vector<8x128xf32>
    %26 = arith.divf %22, %25 : vector<8x128xf32>
    %c4_i32_14 = arith.constant 4 : i32
    %27 = vector.broadcast %c4_i32_14 : i32 to vector<8x128xi32>
    %28 = arith.cmpi eq, %13, %27 : vector<8x128xi32>
    %29 = arith.select %28, %12, %26 : vector<8x128xi1>, vector<8x128xf32>
    %c0_15 = arith.constant 0 : index
    %c0_16 = arith.constant 0 : index
    %30 = vector.load %arg6[%c0_15, %c0_16] : memref<8x128xf32, #tpu.memory_space<vmem>>, vector<8x128xf32>
    tpu.vector_store %arg6[%c0_15, %c0_16], %29 {strides = array<i32>} : memref<8x128xf32, #tpu.memory_space<vmem>>, vector<8x128xf32>,
    return
  }
  func.func @transform_0(%arg0: i32) -> (i32, i32) {
    %c0_i32 = arith.constant 0 : i32
    %c0_i32_0 = arith.constant 0 : i32
    return %arg0, %c0_i32 : i32, i32
  }
  func.func @transform_1(%arg0: i32) -> (i32, i32) {
    %c0_i32 = arith.constant 0 : i32
    %c0_i32_0 = arith.constant 0 : i32
    %c0_i32_1 = arith.constant 0 : i32
    return %c0_i32, %c0_i32_0 : i32, i32
  }
  func.func @transform_2(%arg0: i32) -> (i32, i32) {
    %c0_i32 = arith.constant 0 : i32
    %c0_i32_0 = arith.constant 0 : i32
    %c0_i32_1 = arith.constant 0 : i32
    return %c0_i32, %c0_i32_0 : i32, i32
  }
  func.func @transform_3(%arg0: i32) -> (i32, i32) {
    %c0_i32 = arith.constant 0 : i32
    %c0_i32_0 = arith.constant 0 : i32
    %c0_i32_1 = arith.constant 0 : i32
    return %c0_i32, %c0_i32_0 : i32, i32
  }
  func.func @transform_4(%arg0: i32) -> (i32, i32) {
    %c0_i32 = arith.constant 0 : i32
    %c0_i32_0 = arith.constant 0 : i32
    %c0_i32_1 = arith.constant 0 : i32
    return %c0_i32, %c0_i32_0 : i32, i32
  }
  func.func @transform_5(%arg0: i32) -> (i32, i32) {
    %c0_i32 = arith.constant 0 : i32
    %c0_i32_0 = arith.constant 0 : i32
    return %arg0, %c0_i32 : i32, i32
  }
}

</mosaic_0001>

<bundles_post_ra>
// kernel: tpu_custom_call.1
= control target key start
LH: loop header
LB: loop body
LE: loop exit
PB: predicated region body
PF: predicated region fallthrough
CT: control target
= control target key end

     0   :  { %10 = vsyncpa [#allocation3], 0  ;;  %s489_s0 = inlined_call_operand.hbm [shape: f32[8,16], index: 0, kind: input, shape index: {}]   ;;  %s490_s1 = inlined_call_operand.hbm [shape: f32[16,128], index: 1, kind: input, shape index: {}]   ;;  %s491_s2 = inlined_call_operand.vmem [shape: f32[1,128], index: 2, kind: input, shape index: {}]   ;;  %s492_s3 = inlined_call_operand.hbm [shape: f32[128,128], index: 3, kind: input, shape index: {}]   ;;  %s493_s4 = inlined_call_operand.vmem [shape: f32[1,128], index: 4, kind: input, shape index: {}]   ;;  %s494_s5 = inlined_call_operand.hbm [shape: f32[8,128], index: 5, kind: output, shape index: {}]  }
   0x1   :  { %11 = vsyncpa [#allocation6], 0 }
   0x2   :  { %12 = vsyncpa [#allocation4], 0  ;;  %s433_s18 = smov [#allocation5]  }
   0x3   :  { %s28_s19 = sshll.u32 %s433_s18, 4  ;;  %s29_s19 = int_to_ptr.vmem [resolvable:$true] %s28_s19 }
   0x4   :  { %s355_s20 = scalar_lea.vmem %s29_s19, 256  ;;  %p360_p1 = scmp.lt.s32.totalorder %s29_s19, %s29_s19 }
   0x5   :  { %p356_p0 = scmp.ne.s32.totalorder %s29_s19, %s355_s20  ;;  %p361_p2 = scmp.lt.s32.totalorder %s355_s20, %s355_s20 }
   0x7   :  { %p362_p3 = por %p361_p2, %p360_p1 }
   0x9   :  { %p363_p4 = pnand %p362_p3, %p356_p0 }
   0xb   :  { %366 = shalt.err (!%p363_p4)
}
   0xc   :  { %s434_s21 = smov 128   ;;  %s435_s22 = smov 8  }
   0xd   :  { %34 = dma.hbm_to_vmem [thread:$0]  %s490_s1, 256, %s29_s19, [#allocation6], %s434_s21, %s434_s21, %s435_s22  }
   0xe   :  { %s436_s25 = smov [#allocation2]   ;;  %s437_s27 = smov [#allocation7]  }
   0xf   :  { %s19_s26 = sshll.u32 %s436_s25, 4  ;;  %s42_s28 = sshll.u32 %s437_s27, 4  ;;  %s20_s26 = int_to_ptr.vmem [resolvable:$true] %s19_s26  ;;  %s43_s28 = int_to_ptr.vmem [resolvable:$true] %s42_s28 }
  0x10   :  { %s375_s29 = scalar_lea.vmem %s20_s26, 128  ;;  %p380_p6 = scmp.lt.s32.totalorder %s20_s26, %s20_s26 }
  0x11   :  { %p376_p5 = scmp.ne.s32.totalorder %s20_s26, %s375_s29  ;;  %p381_p7 = scmp.lt.s32.totalorder %s375_s29, %s375_s29 }
  0x13   :  { %p382_p8 = por %p381_p7, %p380_p6 }
  0x15   :  { %p383_p9 = pnand %p382_p8, %p376_p5 }
  0x17   :  { %386 = shalt.err (!%p383_p9)
}
  0x18   :  { %22 = dma.hbm_to_vmem [thread:$0]  %s489_s0, 128, %s20_s26, [#allocation3]  }
  0x19   :  { %s395_s7 = scalar_lea.vmem %s43_s28, 2048  ;;  %p400_p11 = scmp.lt.s32.totalorder %s43_s28, %s43_s28 }
  0x1a   :  { %p396_p10 = scmp.ne.s32.totalorder %s43_s28, %s395_s7  ;;  %p401_p12 = scmp.lt.s32.totalorder %s395_s7, %s395_s7 }
  0x1c   :  { %p402_p13 = por %p401_p12, %p400_p11 }
  0x1e   :  { %p403_p0 = pnand %p402_p13, %p396_p10 }
  0x20   :  { %406 = shalt.err (!%p403_p0)
}
  0x21   :  { %48 = dma.hbm_to_vmem [thread:$0]  %s492_s3, 2048, %s43_s28, [#allocation6], %s434_s21, %s434_s21, %s435_s22  }
  0x22   :  { %427 = dma.done.wait [#allocation3], 128  }
  0x23   :  { %428 = vsyncadd [#allocation3], 4294967168 }
  0x24   :  { %429 = dma.done.wait [#allocation6], 2304  }
  0x25   :  { %430 = vsyncadd [#allocation6], 4294964992  ;;  %v438_v0 = vmov 0.0   ;;  %vm439_vm0 = vmmov 0   ;;  %v62_v1 = vld [vmem:[#allocation5 + $0x8] sm:$0xff]  ;;  %v61_v2 = vld [vmem:[#allocation5] sm:$0xff]  ;;  %v238_v25 = vlaneseq }
  0x26   :  { %293 = vmatprep.subr.mxu0 %v438_v0  ;;  %297 = vmatprep.mubr.msk.f32.mxu0 %vm439_vm0, %v438_v0  ;;  %v60_v3 = vld [vmem:[#allocation2] sm:$0xff]  ;;  %vm70_vm1 = vcmask 130048   ;;  %v160_v4 = vld [vmem:[#allocation7 + $0x78] sm:$0xff]  ;;  %v159_v5 = vld [vmem:[#allocation7 + $0x70] sm:$0xff] }
  0x27   :  { %300 = vmatprep.subr.mxu1 %v438_v0  ;;  %332 = vmatprep.mubr.msk.f32.mxu1 %vm439_vm0, %v438_v0  ;;  %v158_v6 = vld [vmem:[#allocation7 + $0x68] sm:$0xff]  ;;  %v157_v7 = vld [vmem:[#allocation7 + $0x60] sm:$0xff]  ;;  %v156_v8 = vld [vmem:[#allocation7 + $0x58] sm:$0xff]  ;;  %v239_v26 = vand.u32 127, %v238_v25 }
  0x28   :  { %294 = vmatpush3.msra.mxu0 %v62_v1  ;;  %301 = vmatpush3.msra.mxu1 %v160_v4  ;;  %v155_v9 = vld [vmem:[#allocation7 + $0x50] sm:$0xff]  ;;  %v154_v10 = vld [vmem:[#allocation7 + $0x48] sm:$0xff]  ;;  %v153_v11 = vld [vmem:[#allocation7 + $0x40] sm:$0xff] }
  0x29   :  { %295 = vmatprep.subr.mxu0 %v438_v0  ;;  %302 = vmatprep.subr.mxu1 %v438_v0  ;;  %v152_v12 = vld [vmem:[#allocation7 + $0x38] sm:$0xff]  ;;  %v151_v13 = vld [vmem:[#allocation7 + $0x30] sm:$0xff]  ;;  %v150_v14 = vld [vmem:[#allocation7 + $0x28] sm:$0xff]  ;;  %vm240_vm2 = vcmp.lt.s32.totalorder %v239_v26, 4  ;;  %vm251_vm3 = vcmp.eq.s32.totalorder %v239_v26, 4 }
  0x2a   :  { %296 = vmatpush3.msra.mxu0 %v61_v2  ;;  %303 = vmatpush3.msra.mxu1 %v159_v5  ;;  %v149_v15 = vld [vmem:[#allocation7 + $0x20] sm:$0xff]  ;;  %v148_v16 = vld [vmem:[#allocation7 + $0x18] sm:$0xff]  ;;  %v147_v17 = vld [vmem:[#allocation7 + $0x10] sm:$0xff] }
  0x2b   :  { %298 = vmatmul.mubr.msk.f32.vlgmr.msra.gmra.mxu0 %vm70_vm1, %v60_v3  ;;  %304 = vmatprep.subr.mxu1 %v438_v0  ;;  %v146_v18 = vld [vmem:[#allocation7 + $0x8] sm:$0xff]  ;;  %v145_v19 = vld [vmem:[#allocation7] sm:$0xff] }
  0x2c   :  { %305 = vmatpush3.msra.mxu1 %v158_v6  ;;  %v270_v20 = vld [vmem:[%s491_s2] ss:$0 sm:$0xff]  ;;  %s440_s2 = smov [#allocation8]  }
  0x2d   :  { %306 = vmatprep.subr.mxu1 %v438_v0  ;;  %v272_v27 = vld [vmem:[%s493_s4] ss:$0 sm:$0xff]  ;;  %s260_s11 = sshll.u32 %s440_s2, 4  ;;  %s261_s11 = int_to_ptr.vmem [resolvable:$true] %s260_s11 }
  0x2e   :  { %307 = vmatpush3.msra.mxu1 %v157_v7  ;;  %s407_s4 = scalar_lea.vmem %s261_s11, 128  ;;  %p412_p2 = scmp.lt.s32.totalorder %s261_s11, %s261_s11 }
  0x2f   :  { %308 = vmatprep.subr.mxu1 %v438_v0  ;;  %p408_p1 = scmp.ne.s32.totalorder %s261_s11, %s407_s4  ;;  %p413_p3 = scmp.lt.s32.totalorder %s407_s4, %s407_s4 }
  0x30   :  { %309 = vmatpush3.msra.mxu1 %v156_v8 }
  0x31   :  { %310 = vmatprep.subr.mxu1 %v438_v0  ;;  %p414_p4 = por %p413_p3, %p412_p2 }
  0x32   :  { %311 = vmatpush3.msra.mxu1 %v155_v9 }
  0x33   :  { %312 = vmatprep.subr.mxu1 %v438_v0  ;;  %p415_p5 = pnand %p414_p4, %p408_p1 }
  0x34   :  { %313 = vmatpush3.msra.mxu1 %v154_v10 }
  0x35   :  { %314 = vmatprep.subr.mxu1 %v438_v0 }
  0x36   :  { %315 = vmatpush3.msra.mxu1 %v153_v11 }
  0x37   :  { %316 = vmatprep.subr.mxu1 %v438_v0 }
  0x38   :  { %317 = vmatpush3.msra.mxu1 %v152_v12 }
  0x39   :  { %318 = vmatprep.subr.mxu1 %v438_v0 }
  0x3a   :  { %319 = vmatpush3.msra.mxu1 %v151_v13 }
  0x3b   :  { %320 = vmatprep.subr.mxu1 %v438_v0 }
  0x3c   :  { %321 = vmatpush3.msra.mxu1 %v150_v14 }
  0x3d   :  { %322 = vmatprep.subr.mxu1 %v438_v0 }
  0x3e   :  { %323 = vmatpush3.msra.mxu1 %v149_v15 }
  0x3f   :  { %324 = vmatprep.subr.mxu1 %v438_v0 }
  0x40   :  { %325 = vmatpush3.msra.mxu1 %v148_v16 }
  0x41   :  { %326 = vmatprep.subr.mxu1 %v438_v0 }
  0x42   :  { %327 = vmatpush3.msra.mxu1 %v147_v17 }
  0x43   :  { %328 = vmatprep.subr.mxu1 %v438_v0 }
  0x44   :  { %329 = vmatpush3.msra.mxu1 %v146_v18 }
  0x45   :  { %330 = vmatprep.subr.mxu1 %v438_v0 }
  0x46   :  { %331 = vmatpush3.msra.mxu1 %v145_v19 }
  0xeb   :  { %v140_v21 = vpop.f32.mrf.mxu0 }
  0xec   :  { %v141_v22 = vadd.f32 %v270_v20, %v140_v21 }
  0xed   :  { %v299_v23 = vpop.f32.mrf.mxu0 }
  0xee   :  { %v144_v24 = vmax.f32 %v141_v22, 0.0 }
  0xf0   :  { %333 = vmatmul.mubr.f32.vlgmr.msra.gmra.mxu1 %v144_v24 }
 0x1b0   :  { %v234_v28 = vpop.f32.mrf.mxu1 }
 0x1b1   :  { %v235_v29 = vadd.f32 %v272_v27, %v234_v28 }
 0x1b2   :  { %v334_v30 = vpop.f32.mrf.mxu1 }
 0x1b3   :  { %v241_v31 = vsel %vm240_vm2, %v235_v29, -1e+30 }
 0x1b4   :  { %242 = vmax.xlane.f32.xlu0 %v241_v31 }
 0x23d   :  { %v243_v32 = vpop.xlane.xlu0 %242 }
 0x23e   :  { %v244_v33 = vsub.f32 %v241_v31, %v243_v32 }
 0x240   :  { %v245_v34 = vmul.f32 1.442695, %v244_v33 }
 0x242   :  { %343 = vpow2.f32 %v245_v34 }
 0x24f   :  { %v344_v35 = vpop.eup %343 }
 0x250   :  { %247 = vadd.xlane.f32.xlu0 %v344_v35 }
 0x2d9   :  { %v248_v36 = vpop.xlane.xlu0 %247 }
 0x2da   :  { %345 = vrcp.f32 %v248_v36 }
 0x2e7   :  { %v346_v37 = vpop.eup %345 }
 0x2e8   :  { %v250_v38 = vmul.f32 %v346_v37, %v344_v35 }
 0x2ea   :  { %v252_v39 = vsel %vm251_vm3, %v235_v29, %v250_v38 }
 0x2eb   :  { %253 = vst [vmem:[#allocation8] sm:$0xff] %v252_v39 }
 0x2ec   :  { %418 = shalt.err (!%p415_p5)
}
 0x2ed   :  { %263 = dma.vmem_to_hbm [thread:$0]  %s261_s11, 128, %s494_s5, [#allocation4]  }
 0x2ee   :  { %431 = dma.done.wait [#allocation4], 128  }
 0x2ef   :  { %432 = vsyncadd [#allocation4], 4294967168 }
 0x2f0   :  { %267 = vsyncpa [#allocation3], 1 }
 0x2f1   :  { %268 = vsyncpa [#allocation6], 1 }
 0x2f2   :  { %269 = vsyncpa [#allocation4], 1 }

</bundles_post_ra>
